<compile_context>
chip_gen: v5e
topology: v5e:2x2
jax: 0.10.0
libtpu: 0.0.40
codegen_flags: <defaults>
</compile_context>

<pallas_src>
import numpy as np
import jax
import jax.numpy as jnp
from jax import lax
from jax.experimental import pallas as pl
from jax.experimental.pallas import tpu as pltpu

LANE = 128


# ----------------------------------------------------------------------------
# Pallas kernel: the full query circuit
#   q0 <- XZ[0] @ e0                     (hoisted to host: xz0_bcast input)
#   for q in range(Q): q0 <- oracle[q] * q0 ; q0 <- XZ[q+1] @ q0
#   prob = |q0|^2 ; col = sum(mmT * prob, axis=0)
#   loss = 1 - sum(col)/N ; err = 1 - min(col)      (padded lanes masked)
# ----------------------------------------------------------------------------
def _make_kernel(num_query, dim_total, n_true, n_pad):
    D, Q = dim_total, num_query
    D2 = 2 * D
    inv_n = 1.0 / float(n_true)

    def kernel(xz0_ref, xz_blk_ref, orc_a_ref, orc_b_ref, mmT_ref, out_ref):
        # State after the first unitary, already broadcast over all lanes.
        packed = xz0_ref[...]                                 # (2D, n_pad) f32

        # Static unroll: Q is small.  TODO(synk): for large Q switch to
        # lax.fori_loop + a q grid axis / pl.Buffered streaming of the
        # per-layer oracle planes so they are not all VMEM-resident.
        for q in range(Q):
            # Oracle phase: complex elementwise mul in packed re/im planes.
            # Half-swap of re/im goes through the XLU rotate slot (free here).
            swapped = pltpu.roll(packed, shift=D, axis=0)
            packed = orc_a_ref[q] * packed + orc_b_ref[q] * swapped
            # Unitary q+1: one packed real block matmul == complex matmul.
            packed = jnp.dot(xz_blk_ref[q], packed,
                             preferred_element_type=jnp.float32)

        qr = packed[:D, :]
        qi = packed[D:, :]
        prob = qr * qr + qi * qi                              # (q0*conj(q0)).real
        col = jnp.sum(mmT_ref[...] * prob, axis=0, keepdims=True)   # (1, n_pad)

        # Padded measure columns are zero, so the plain sum is already the
        # true-column sum; divide by the true bitstring count.
        loss = 1.0 - jnp.sum(col) * jnp.float32(inv_n)

        # The min must ignore padded lanes (their col is 0).
        lane = lax.broadcasted_iota(jnp.int32, (1, n_pad), 1)
        col_masked = jnp.where(lane < n_true, col, jnp.float32(1e30))
        err = 1.0 - jnp.min(col_masked)

        out_ref[0] = loss
        out_ref[1] = err

    return kernel


def hamming_query_forward(xz0_bcast, xz_blk, orc_a, orc_b, mmT, n_true):
    Q, D2 = xz_blk.shape[0], xz_blk.shape[1]
    D = D2 // 2
    n_pad = orc_a.shape[2]
    kernel = _make_kernel(Q, D, n_true, n_pad)
    out = pl.pallas_call(
        kernel,
        out_shape=jax.ShapeDtypeStruct((2,), jnp.float32),
        grid=(1,),
        in_specs=[
            pl.BlockSpec((D2, n_pad), lambda i: (0, 0)),
            pl.BlockSpec((Q, D2, D2), lambda i: (0, 0, 0)),
            pl.BlockSpec((Q, D2, n_pad), lambda i: (0, 0, 0)),
            pl.BlockSpec((Q, D2, n_pad), lambda i: (0, 0, 0)),
            pl.BlockSpec((D, n_pad), lambda i: (0, 0)),
        ],
        out_specs=pl.BlockSpec(memory_space=pltpu.MemorySpace.SMEM),
        compiler_params=pltpu.CompilerParams(
            dimension_semantics=("arbitrary",)),
    )(xz0_bcast, xz_blk, orc_a, orc_b, mmT)
    # loss ; error_rate = 1 - min(sum(mmT * prob, dim=0))
    return out[0], out[1]


# ----------------------------------------------------------------------------
# Deterministic parameter / input construction (glue, plain JAX + numpy)
# ----------------------------------------------------------------------------
def build_inputs(key, num_query=3, dim_query=2, num_bit=3, partition=(4, 4)):
    partition = np.asarray(partition)
    dim_total = int(partition.sum())
    assert dim_total % dim_query == 0
    n_state = 2 ** num_bit
    n_pad = max(LANE, ((n_state + LANE - 1) // LANE) * LANE)

    # TODO(synk): numqi helpers (get_measure_matrix, get_xbit, bitmap,
    # SpecialOrthogonal manifold) are re-implemented deterministically here;
    # the forward-pass pipeline (unitary -> oracle phase -> measurement) is
    # reproduced exactly on those stand-ins.
    popcount = np.array([bin(i).count("1") for i in range(n_state)])
    bitmap = popcount % len(partition)                          # (n_state,)

    # measure_matrix_T: (dim_total, n_state), 1 on partition block bitmap[x]
    starts = np.concatenate([[0], np.cumsum(partition)])
    measure = np.zeros((n_state, dim_total), dtype=np.float64)
    for x in range(n_state):
        b = bitmap[x]
        measure[x, starts[b]:starts[b + 1]] = 1.0
    measure_T = measure.T.copy()                                # (D, N)

    # x_bit: (n_state, dim_query), oracle exponent per (bitstring, level)
    x_bit = np.arange(dim_query)[None, :] * popcount[:, None]   # int64

    # alpha parameter init (use_fractional=True -> ones(num_query)), alpha % 2
    alpha = np.ones(num_query, dtype=np.float64) % 2.0

    # oracle phase per query, broadcast to the full workspace:
    # phase[q] = exp(-1j*pi*alpha[q]*x_bit).T  (dim_query, n_state), each row
    # repeated dim_total//dim_query times -> (dim_total, n_state)
    rep = dim_total // dim_query
    orc = np.stack([
        np.repeat(np.exp(-1j * np.pi * alpha[q] * x_bit).T, rep, axis=0)
        for q in range(num_query)
    ], axis=0)                                                  # (Q, D, N) c128

    # XZ: batch of (num_query+1) unitaries (manifold branch, num_XZ=None),
    # generated deterministically via QR of complex Gaussians.
    k1, k2 = jax.random.split(key)
    g_re = np.asarray(jax.random.normal(k1, (num_query + 1, dim_total, dim_total)),
                      dtype=np.float64)
    g_im = np.asarray(jax.random.normal(k2, (num_query + 1, dim_total, dim_total)),
                      dtype=np.float64)
    xz = np.stack([np.linalg.qr(g_re[i] + 1j * g_im[i])[0]
                   for i in range(num_query + 1)], axis=0)      # (Q+1, D, D) c128

    # --- pack for the TPU kernel (float32, lane axis padded to n_pad) ---
    xz_re = xz.real.astype(np.float32)
    xz_im = xz.imag.astype(np.float32)

    # First unitary applied to e0 (= column 0 of packed XZ[0]), pre-broadcast
    # over all padded lanes on the host.
    xz0_col = np.concatenate([xz_re[0][:, 0], xz_im[0][:, 0]])  # (2D,)
    xz0_bcast = np.broadcast_to(
        xz0_col[:, None], (2 * dim_total, n_pad)).astype(np.float32).copy()

    # Remaining unitaries packed as [[re, -im], [im, re]].
    top = np.concatenate([xz_re[1:], -xz_im[1:]], axis=2)
    bot = np.concatenate([xz_im[1:], xz_re[1:]], axis=2)
    xz_blk = np.concatenate([top, bot], axis=1)                 # (Q, 2D, 2D)

    orc_re = orc.real.astype(np.float32)
    orc_im = orc.imag.astype(np.float32)
    orc_a = np.concatenate([orc_re, orc_re], axis=1)            # (Q, 2D, N)
    orc_b = np.concatenate([-orc_im, orc_im], axis=1)           # (Q, 2D, N)
    pad = n_pad - n_state
    orc_a = np.pad(orc_a, ((0, 0), (0, 0), (0, pad)))
    orc_b = np.pad(orc_b, ((0, 0), (0, 0), (0, pad)))

    mmT = np.pad(measure_T.astype(np.float32), ((0, 0), (0, pad)))  # (D, n_pad)

    inputs = (jnp.asarray(xz0_bcast), jnp.asarray(xz_blk),
              jnp.asarray(orc_a), jnp.asarray(orc_b), jnp.asarray(mmT))
    meta = dict(xz=xz, alpha=alpha, x_bit=x_bit, measure_T=measure_T,
                dim_query=dim_query, n_state=n_state)
    return inputs, meta


def reference_forward(meta):
    """Pure numpy complex128 reference mirroring the PyTorch forward()."""
    xz = meta["xz"].astype(np.complex64).astype(np.complex128)  # match f32 inputs
    alpha = meta["alpha"] % 2
    x_bit = meta["x_bit"]
    measure_T = meta["measure_T"]
    dim_query = meta["dim_query"]
    Qp1, D, _ = xz.shape
    N = x_bit.shape[0]
    q0 = np.zeros((D, N), dtype=np.complex128)
    q0[0] = 1
    for q in range(Qp1 - 1):
        q0 = xz[q] @ q0
        tmp0 = np.exp(-1j * np.pi * alpha[q] * x_bit).T.reshape(dim_query, 1, -1)
        q0 = (tmp0 * q0.reshape(dim_query, -1, q0.shape[1])).reshape(D, -1)
    q0 = xz[Qp1 - 1] @ q0
    tmp0 = (q0 * q0.conj()).real
    loss = 1 - np.sum(measure_T * tmp0) / q0.shape[1]
    error_rate = 1 - np.min(np.sum(measure_T * tmp0, axis=0))
    return loss, error_rate


if __name__ == "__main__":
    key = jax.random.PRNGKey(0)
    inputs, meta = build_inputs(key, num_query=3, dim_query=2, num_bit=3,
                                partition=(4, 4))

    loss, error_rate = hamming_query_forward(*inputs, meta["n_state"])
    loss = jax.block_until_ready(loss)
    error_rate = jax.block_until_ready(error_rate)

    ref_loss, ref_err = reference_forward(meta)
    assert abs(float(loss) - ref_loss) < 1e-3, (float(loss), ref_loss)
    assert abs(float(error_rate) - ref_err) < 1e-3, (float(error_rate), ref_err)

    print("KERNEL_OK")
</pallas_src>

<mosaic_0001>
module attributes {stable_mosaic.version = 11 : i64} {
  func.func @kernel(%arg0: i32, %arg1: memref<16x128xf32, #tpu.memory_space<vmem>>, %arg2: memref<3x16x16xf32, #tpu.memory_space<vmem>>, %arg3: memref<3x16x128xf32, #tpu.memory_space<vmem>>, %arg4: memref<3x16x128xf32, #tpu.memory_space<vmem>>, %arg5: memref<8x128xf32, #tpu.memory_space<vmem>>, %arg6: memref<2xf32, #tpu.memory_space<smem>>) attributes {dimension_semantics = [#tpu.dimension_semantics<arbitrary>], iteration_bounds = array<i64: 1>, scalar_prefetch = 0 : i64, scratch_operands = 0 : i64, tpu.core_type = #tpu.core_type<tc>, window_params = [{pipeline_mode = #tpu.pipeline_mode<synchronous>, transform_indices = @transform_0, window_bounds = array<i64: 16, 128>}, {pipeline_mode = #tpu.pipeline_mode<synchronous>, transform_indices = @transform_1, window_bounds = array<i64: 3, 16, 16>}, {pipeline_mode = #tpu.pipeline_mode<synchronous>, transform_indices = @transform_2, window_bounds = array<i64: 3, 16, 128>}, {pipeline_mode = #tpu.pipeline_mode<synchronous>, transform_indices = @transform_3, window_bounds = array<i64: 3, 16, 128>}, {pipeline_mode = #tpu.pipeline_mode<synchronous>, transform_indices = @transform_4, window_bounds = array<i64: 8, 128>}, {transform_indices = @transform_5, window_bounds = array<i64: 2>}]} {
    %c0 = arith.constant 0 : index
    %c0_0 = arith.constant 0 : index
    %0 = vector.load %arg1[%c0, %c0_0] : memref<16x128xf32, #tpu.memory_space<vmem>>, vector<16x128xf32>
    %c8_i32 = arith.constant 8 : i32
    %1 = tpu.dynamic_rotate %0 by %c8_i32 dim 0 : vector<16x128xf32>, i32 -> vector<16x128xf32>
    %c0_1 = arith.constant 0 : index
    %c0_2 = arith.constant 0 : index
    %c0_3 = arith.constant 0 : index
    %2 = vector.load %arg3[%c0_1, %c0_2, %c0_3] : memref<3x16x128xf32, #tpu.memory_space<vmem>>, vector<1x16x128xf32>
    %3 = vector.shape_cast %2 : vector<1x16x128xf32> to vector<16x128xf32>
    %4 = arith.mulf %3, %0 : vector<16x128xf32>
    %c0_4 = arith.constant 0 : index
    %c0_5 = arith.constant 0 : index
    %c0_6 = arith.constant 0 : index
    %5 = vector.load %arg4[%c0_4, %c0_5, %c0_6] : memref<3x16x128xf32, #tpu.memory_space<vmem>>, vector<1x16x128xf32>
    %6 = vector.shape_cast %5 : vector<1x16x128xf32> to vector<16x128xf32>
    %7 = arith.mulf %6, %1 : vector<16x128xf32>
    %8 = arith.addf %4, %7 : vector<16x128xf32>
    %c0_7 = arith.constant 0 : index
    %c0_8 = arith.constant 0 : index
    %c0_9 = arith.constant 0 : index
    %9 = vector.load %arg2[%c0_7, %c0_8, %c0_9] : memref<3x16x16xf32, #tpu.memory_space<vmem>>, vector<1x16x16xf32>
    %10 = vector.shape_cast %9 : vector<1x16x16xf32> to vector<16x16xf32>
    %cst = arith.constant dense<0.000000e+00> : vector<16x128xf32>
    %11 = tpu.matmul %10, %8, %cst {dimension_numbers = #tpu.dot_dimension_numbers<[1], [0], [0], [1], [0, 0, 1, 1], [], []>} : vector<16x16xf32>, vector<16x128xf32>, vector<16x128xf32> -> vector<16x128xf32>
    %c8_i32_10 = arith.constant 8 : i32
    %12 = tpu.dynamic_rotate %11 by %c8_i32_10 dim 0 : vector<16x128xf32>, i32 -> vector<16x128xf32>
    %c1 = arith.constant 1 : index
    %c0_11 = arith.constant 0 : index
    %c0_12 = arith.constant 0 : index
    %13 = vector.load %arg3[%c1, %c0_11, %c0_12] : memref<3x16x128xf32, #tpu.memory_space<vmem>>, vector<1x16x128xf32>
    %14 = vector.shape_cast %13 : vector<1x16x128xf32> to vector<16x128xf32>
    %15 = arith.mulf %14, %11 : vector<16x128xf32>
    %c1_13 = arith.constant 1 : index
    %c0_14 = arith.constant 0 : index
    %c0_15 = arith.constant 0 : index
    %16 = vector.load %arg4[%c1_13, %c0_14, %c0_15] : memref<3x16x128xf32, #tpu.memory_space<vmem>>, vector<1x16x128xf32>
    %17 = vector.shape_cast %16 : vector<1x16x128xf32> to vector<16x128xf32>
    %18 = arith.mulf %17, %12 : vector<16x128xf32>
    %19 = arith.addf %15, %18 : vector<16x128xf32>
    %c1_16 = arith.constant 1 : index
    %c0_17 = arith.constant 0 : index
    %c0_18 = arith.constant 0 : index
    %20 = vector.load %arg2[%c1_16, %c0_17, %c0_18] : memref<3x16x16xf32, #tpu.memory_space<vmem>>, vector<1x16x16xf32>
    %21 = vector.shape_cast %20 : vector<1x16x16xf32> to vector<16x16xf32>
    %cst_19 = arith.constant dense<0.000000e+00> : vector<16x128xf32>
    %22 = tpu.matmul %21, %19, %cst_19 {dimension_numbers = #tpu.dot_dimension_numbers<[1], [0], [0], [1], [0, 0, 1, 1], [], []>} : vector<16x16xf32>, vector<16x128xf32>, vector<16x128xf32> -> vector<16x128xf32>
    %c8_i32_20 = arith.constant 8 : i32
    %23 = tpu.dynamic_rotate %22 by %c8_i32_20 dim 0 : vector<16x128xf32>, i32 -> vector<16x128xf32>
    %c2 = arith.constant 2 : index
    %c0_21 = arith.constant 0 : index
    %c0_22 = arith.constant 0 : index
    %24 = vector.load %arg3[%c2, %c0_21, %c0_22] : memref<3x16x128xf32, #tpu.memory_space<vmem>>, vector<1x16x128xf32>
    %25 = vector.shape_cast %24 : vector<1x16x128xf32> to vector<16x128xf32>
    %26 = arith.mulf %25, %22 : vector<16x128xf32>
    %c2_23 = arith.constant 2 : index
    %c0_24 = arith.constant 0 : index
    %c0_25 = arith.constant 0 : index
    %27 = vector.load %arg4[%c2_23, %c0_24, %c0_25] : memref<3x16x128xf32, #tpu.memory_space<vmem>>, vector<1x16x128xf32>
    %28 = vector.shape_cast %27 : vector<1x16x128xf32> to vector<16x128xf32>
    %29 = arith.mulf %28, %23 : vector<16x128xf32>
    %30 = arith.addf %26, %29 : vector<16x128xf32>
    %c2_26 = arith.constant 2 : index
    %c0_27 = arith.constant 0 : index
    %c0_28 = arith.constant 0 : index
    %31 = vector.load %arg2[%c2_26, %c0_27, %c0_28] : memref<3x16x16xf32, #tpu.memory_space<vmem>>, vector<1x16x16xf32>
    %32 = vector.shape_cast %31 : vector<1x16x16xf32> to vector<16x16xf32>
    %cst_29 = arith.constant dense<0.000000e+00> : vector<16x128xf32>
    %33 = tpu.matmul %32, %30, %cst_29 {dimension_numbers = #tpu.dot_dimension_numbers<[1], [0], [0], [1], [0, 0, 1, 1], [], []>} : vector<16x16xf32>, vector<16x128xf32>, vector<16x128xf32> -> vector<16x128xf32>
    %34 = vector.extract_strided_slice %33 {offsets = [0, 0], sizes = [8, 128], strides = [1, 1]} : vector<16x128xf32> to vector<8x128xf32>
    %35 = vector.extract_strided_slice %33 {offsets = [8, 0], sizes = [8, 128], strides = [1, 1]} : vector<16x128xf32> to vector<8x128xf32>
    %36 = arith.mulf %34, %34 : vector<8x128xf32>
    %37 = arith.mulf %35, %35 : vector<8x128xf32>
    %38 = arith.addf %36, %37 : vector<8x128xf32>
    %c0_30 = arith.constant 0 : index
    %c0_31 = arith.constant 0 : index
    %39 = vector.load %arg5[%c0_30, %c0_31] : memref<8x128xf32, #tpu.memory_space<vmem>>, vector<8x128xf32>
    %40 = arith.mulf %39, %38 : vector<8x128xf32>
    %cst_32 = arith.constant dense<0.000000e+00> : vector<128xf32>
    %41 = vector.multi_reduction <add>, %40, %cst_32 [0] : vector<8x128xf32> to vector<128xf32>
    %42 = vector.shape_cast %41 : vector<128xf32> to vector<1x128xf32>
    %43 = vector.shape_cast %42 : vector<1x128xf32> to vector<1x1x128xf32>
    %cst_33 = arith.constant dense<0.000000e+00> : vector<1xf32>
    %44 = vector.multi_reduction <add>, %43, %cst_33 [1, 2] : vector<1x1x128xf32> to vector<1xf32>
    %45 = vector.shape_cast %44 : vector<1xf32> to vector<1x1x1xf32>
    %46 = vector.extract %45[0, 0, 0] : f32 from vector<1x1x1xf32>
    %cst_34 = arith.constant 1.250000e-01 : f32
    %47 = arith.mulf %46, %cst_34 : f32
    %cst_35 = arith.constant 1.000000e+00 : f32
    %48 = arith.subf %cst_35, %47 : f32
    %49 = tpu.iota {dimensions = array<i32: 1>} : vector<1x128xi32>
    %c8_i32_36 = arith.constant 8 : i32
    %50 = vector.broadcast %c8_i32_36 : i32 to vector<1x128xi32>
    %51 = arith.cmpi slt, %49, %50 : vector<1x128xi32>
    %cst_37 = arith.constant 1.000000e+30 : f32
    %52 = vector.broadcast %cst_37 : f32 to vector<1x128xf32>
    %53 = arith.select %51, %42, %52 : vector<1x128xi1>, vector<1x128xf32>
    %54 = vector.shape_cast %53 : vector<1x128xf32> to vector<1x1x128xf32>
    %cst_38 = arith.constant dense<0x7F800000> : vector<1xf32>
    %55 = vector.multi_reduction <minimumf>, %54, %cst_38 [1, 2] : vector<1x1x128xf32> to vector<1xf32>
    %56 = vector.shape_cast %55 : vector<1xf32> to vector<1x1x1xf32>
    %57 = vector.extract %56[0, 0, 0] : f32 from vector<1x1x1xf32>
    %cst_39 = arith.constant 1.000000e+00 : f32
    %58 = arith.subf %cst_39, %57 : f32
    %c0_40 = arith.constant 0 : index
    %59 = memref.load %arg6[%c0_40] : memref<2xf32, #tpu.memory_space<smem>>
    memref.store %48, %arg6[%c0_40] : memref<2xf32, #tpu.memory_space<smem>>
    %c1_41 = arith.constant 1 : index
    %60 = memref.load %arg6[%c1_41] : memref<2xf32, #tpu.memory_space<smem>>
    memref.store %58, %arg6[%c1_41] : memref<2xf32, #tpu.memory_space<smem>>
    return
  }
  func.func @transform_0(%arg0: i32) -> (i32, i32) {
    %c0_i32 = arith.constant 0 : i32
    %c0_i32_0 = arith.constant 0 : i32
    %c0_i32_1 = arith.constant 0 : i32
    return %c0_i32, %c0_i32_0 : i32, i32
  }
  func.func @transform_1(%arg0: i32) -> (i32, i32, i32) {
    %c0_i32 = arith.constant 0 : i32
    %c0_i32_0 = arith.constant 0 : i32
    %c0_i32_1 = arith.constant 0 : i32
    %c0_i32_2 = arith.constant 0 : i32
    return %c0_i32, %c0_i32_0, %c0_i32_1 : i32, i32, i32
  }
  func.func @transform_2(%arg0: i32) -> (i32, i32, i32) {
    %c0_i32 = arith.constant 0 : i32
    %c0_i32_0 = arith.constant 0 : i32
    %c0_i32_1 = arith.constant 0 : i32
    %c0_i32_2 = arith.constant 0 : i32
    return %c0_i32, %c0_i32_0, %c0_i32_1 : i32, i32, i32
  }
  func.func @transform_3(%arg0: i32) -> (i32, i32, i32) {
    %c0_i32 = arith.constant 0 : i32
    %c0_i32_0 = arith.constant 0 : i32
    %c0_i32_1 = arith.constant 0 : i32
    %c0_i32_2 = arith.constant 0 : i32
    return %c0_i32, %c0_i32_0, %c0_i32_1 : i32, i32, i32
  }
  func.func @transform_4(%arg0: i32) -> (i32, i32) {
    %c0_i32 = arith.constant 0 : i32
    %c0_i32_0 = arith.constant 0 : i32
    %c0_i32_1 = arith.constant 0 : i32
    return %c0_i32, %c0_i32_0 : i32, i32
  }
  func.func @transform_5(%arg0: i32) -> i32 {
    %c0_i32 = arith.constant 0 : i32
    %c0_i32_0 = arith.constant 0 : i32
    return %c0_i32 : i32
  }
}

</mosaic_0001>

<bundles_post_ra>
// kernel: tpu_custom_call.1
= control target key start
LH: loop header
LB: loop body
LE: loop exit
PB: predicated region body
PF: predicated region fallthrough
CT: control target
= control target key end

     0   :  { %10 = vsyncpa [#allocation3], 0  ;;  %s505_s0 = inlined_call_operand.hbm [shape: f32[16,128], index: 0, kind: input, shape index: {}]   ;;  %s506_s1 = inlined_call_operand.hbm [shape: f32[3,16,16], index: 1, kind: input, shape index: {}]   ;;  %s507_s2 = inlined_call_operand.hbm [shape: f32[3,16,128], index: 2, kind: input, shape index: {}]   ;;  %s508_s3 = inlined_call_operand.hbm [shape: f32[3,16,128], index: 3, kind: input, shape index: {}]   ;;  %s509_s4 = inlined_call_operand.hbm [shape: f32[8,128], index: 4, kind: input, shape index: {}]   ;;  %s510_s5 = inlined_call_operand.hbm [shape: f32[2], index: 5, kind: output, shape index: {}]  }
   0x1   :  { %11 = vsyncpa [#allocation6], 0 }
   0x2   :  { %12 = vsyncpa [#allocation9], 0 }
   0x3   :  { %13 = vsyncpa [#allocation4], 0  ;;  %s31_s20 = sshll.u32 %s506_s1, 4  ;;  %s443_s21 = smov [#allocation5]   ;;  %s32_s20 = int_to_ptr.hbm [resolvable:$true] %s31_s20 }
   0x4   :  { %s33_s22 = sshll.u32 %s443_s21, 4  ;;  %s57_s25 = sshll.u32 %s508_s3, 4  ;;  %s34_s22 = int_to_ptr.vmem [resolvable:$true] %s33_s22  ;;  %s58_s25 = int_to_ptr.hbm [resolvable:$true] %s57_s25 }
   0x5   :  { %s444_s26 = smov 128   ;;  %s445_s27 = smov 8  }
   0x6   :  { %39 = dma.hbm_to_vmem [thread:$0]  %s32_s20, 768, %s34_s22, [#allocation6], %s444_s26, %s444_s26, %s445_s27  }
   0x7   :  { %s446_s28 = smov [#allocation8]   ;;  %s18_s7 = sshll.u32 %s505_s0, 4  ;;  %s19_s7 = int_to_ptr.hbm [resolvable:$true] %s18_s7 }
   0x8   :  { %s59_s29 = sshll.u32 %s446_s28, 4  ;;  %s44_s9 = sshll.u32 %s507_s2, 4  ;;  %s60_s29 = int_to_ptr.vmem [resolvable:$true] %s59_s29  ;;  %s45_s9 = int_to_ptr.hbm [resolvable:$true] %s44_s9 }
   0x9   :  { %65 = dma.hbm_to_vmem [thread:$0]  %s58_s25, 768, %s60_s29, [#allocation9], %s444_s26, %s444_s26, %s445_s27  }
   0xa   :  { %s447_s10 = smov [#allocation2]   ;;  %s448_s3 = smov [#allocation7]  }
   0xb   :  { %s20_s11 = sshll.u32 %s447_s10, 4  ;;  %s46_s12 = sshll.u32 %s448_s3, 4  ;;  %s21_s11 = int_to_ptr.vmem [resolvable:$true] %s20_s11  ;;  %s47_s12 = int_to_ptr.vmem [resolvable:$true] %s46_s12 }
   0xc   :  { %26 = dma.hbm_to_vmem [thread:$0]  %s19_s7, 256, %s21_s11, [#allocation3], %s444_s26, %s444_s26, %s445_s27  }
   0xd   :  { %s71_s15 = sshll.u32 %s509_s4, 4  ;;  %s449_s0 = smov [#allocation10]   ;;  %s72_s15 = int_to_ptr.hbm [resolvable:$true] %s71_s15 }
   0xe   :  { %52 = dma.hbm_to_vmem [thread:$0]  %s45_s9, 768, %s47_s12, [#allocation6], %s444_s26, %s444_s26, %s445_s27  }
   0xf   :  { %s73_s16 = sshll.u32 %s449_s0, 4  ;;  %s74_s16 = int_to_ptr.vmem [resolvable:$true] %s73_s16 }
  0x10   :  { %76 = dma.hbm_to_vmem [thread:$0]  %s72_s15, 128, %s74_s16, [#allocation9]  }
  0x11   :  { %435 = dma.done.wait [#allocation3], 256  }
  0x12   :  { %436 = vsyncadd [#allocation3], 4294967040 }
  0x13   :  { %437 = dma.done.wait [#allocation6], 1536  }
  0x14   :  { %438 = vsyncadd [#allocation6], 4294965760 }
  0x15   :  { %439 = dma.done.wait [#allocation9], 896  }
  0x16   :  { %440 = vsyncadd [#allocation9], 4294966400  ;;  %v97_v0 = vld [vmem:[#allocation2] sm:$0xff]  ;;  %v98_v1 = vld [vmem:[#allocation2 + $0x8] sm:$0xff]  ;;  %vm111_vm0 = vcmask 130048   ;;  %vm240_vm1 = vcmask 1040384   ;;  %v253_v54 = vlaneseq }
  0x17   :  { %v100_v2 = vld [vmem:[#allocation7 + $0x8] sm:$0xff]  ;;  %v104_v4 = vld [vmem:[#allocation8 + $0x8] sm:$0xff]  ;;  %v99_v5 = vld [vmem:[#allocation7] sm:$0xff]  ;;  %s270_s18 = sshll.u32 %s510_s5, 4  ;;  %s450_s23 = smov [#allocation11]   ;;  %s271_s18 = int_to_ptr.hbm [resolvable:$true] %s270_s18 }
  0x18   :  { %v102_v3 = vmul.f32 %v100_v2, %v98_v1  ;;  %v103_v6 = vld [vmem:[#allocation8] sm:$0xff]  ;;  %v106_v7 = vmul.f32 %v104_v4, %v97_v0  ;;  %v101_v8 = vmul.f32 %v99_v5, %v97_v0  ;;  %v110_v12 = vld [vmem:[#allocation5 + $0x8] sm:$0xff]  ;;  %v148_v15 = vld [vmem:[#allocation8 + $0x18] sm:$0xff]  ;;  %v254_v57 = vand.u32 127, %v253_v54 }
  0x19   :  { %v105_v9 = vmul.f32 %v103_v6, %v98_v1  ;;  %v109_v13 = vld [vmem:[#allocation5] sm:$0xff]  ;;  %v143_v17 = vld [vmem:[#allocation7 + $0x18] sm:$0xff]  ;;  %v147_v18 = vld [vmem:[#allocation8 + $0x10] sm:$0xff] }
  0x1a   :  { %v108_v10 = vadd.f32 %v106_v7, %v102_v3  ;;  %v142_v16 = vld [vmem:[#allocation7 + $0x10] sm:$0xff]  ;;  %v154_v26 = vld [vmem:[#allocation5 + $0x10] sm:$0xff]  ;;  %v155_v27 = vld [vmem:[#allocation5 + $0x18] sm:$0xff]  ;;  %vm255_vm2 = vcmp.lt.s32.totalorder %v254_v57, 8 }
  0x1b   :  { %v107_v11 = vadd.f32 %v105_v9, %v101_v8  ;;  %v192_v29 = vld [vmem:[#allocation8 + $0x28] sm:$0xff]  ;;  %v187_v30 = vld [vmem:[#allocation7 + $0x28] sm:$0xff]  ;;  %v191_v31 = vld [vmem:[#allocation8 + $0x20] sm:$0xff] }
  0x1c   :  { %289 = vmatpush.msra.mxu3 %v108_v10  ;;  %132 = vmatpush.msra.mxu0 %v108_v10  ;;  %v186_v32 = vld [vmem:[#allocation7 + $0x20] sm:$0xff]  ;;  %v198_v40 = vld [vmem:[#allocation5 + $0x20] sm:$0xff]  ;;  %v199_v41 = vld [vmem:[#allocation5 + $0x28] sm:$0xff] }
  0x1d   :  { %v232_v46 = vld [vmem:[#allocation10] sm:$0xff] }
  0x1e   :  { %290 = vmatpush.msra.mxu3 %v107_v11  ;;  %133 = vmatpush.msra.mxu0 %v107_v11 }
  0x1f   :  { %284 = vmatmul.msk.f32.vlgmr.msra.gmra.mxu3 %vm111_vm0, %v110_v12  ;;  %283 = vmatmul.msk.f32.vlgmr.msra.gmra.mxu0 %vm111_vm0, %v109_v13 }
  0x9c   :  { %v135_v14 = vpop.f32.mrf.mxu0 }
  0x9d   :  { %v150_v19 = vmul.f32 %v148_v15, %v135_v14  ;;  %v144_v21 = vmul.f32 %v142_v16, %v135_v14 }
  0xa2   :  { %v138_v20 = vpop.f32.mrf.mxu3 }
  0xa3   :  { %v145_v22 = vmul.f32 %v143_v17, %v138_v20  ;;  %v149_v23 = vmul.f32 %v147_v18, %v138_v20 }
  0xa5   :  { %v152_v24 = vadd.f32 %v150_v19, %v145_v22  ;;  %v151_v25 = vadd.f32 %v149_v23, %v144_v21 }
  0xa7   :  { %176 = vmatpush.msra.mxu1 %v152_v24 }
  0xa9   :  { %177 = vmatpush.msra.mxu1 %v151_v25 }
  0xaa   :  { %285 = vmatmul.msk.f32.vlgmr.msra.gmra.mxu1 %vm111_vm0, %v154_v26 }
  0xb2   :  { %286 = vmatmul.msk.f32.gmra.mxu1 %vm111_vm0, %v155_v27 }
 0x127   :  { %v179_v28 = vpop.f32.mrf.mxu1 }
 0x128   :  { %v194_v34 = vmul.f32 %v192_v29, %v179_v28  ;;  %v188_v37 = vmul.f32 %v186_v32, %v179_v28 }
 0x12f   :  { %v182_v33 = vpop.f32.mrf.mxu1 }
 0x130   :  { %v189_v35 = vmul.f32 %v187_v30, %v182_v33  ;;  %v193_v36 = vmul.f32 %v191_v31, %v182_v33 }
 0x132   :  { %v196_v38 = vadd.f32 %v194_v34, %v189_v35  ;;  %v195_v39 = vadd.f32 %v193_v36, %v188_v37 }
 0x134   :  { %220 = vmatpush.msra.mxu2 %v196_v38 }
 0x136   :  { %221 = vmatpush.msra.mxu2 %v195_v39 }
 0x137   :  { %287 = vmatmul.msk.f32.vlgmr.msra.gmra.mxu2 %vm111_vm0, %v198_v40 }
 0x13f   :  { %288 = vmatmul.msk.f32.gmra.mxu2 %vm111_vm0, %v199_v41 }
 0x1ba   :  { %v223_v42 = vpop.f32.mrf.mxu2 }
 0x1bb   :  { %v229_v44 = vmul.f32 %v223_v42, %v223_v42 }
 0x1c2   :  { %v226_v43 = vpop.f32.mrf.mxu2 }
 0x1c3   :  { %v230_v45 = vmul.f32 %v226_v43, %v226_v43 }
 0x1c5   :  { %v231_v47 = vadd.f32 %v230_v45, %v229_v44 }
 0x1c7   :  { %v233_v48 = vmul.f32 %v232_v46, %v231_v47 }
 0x1c9   :  { %v234_v49 = vrot.slane %v233_v48, 4 }
 0x1cb   :  { %v235_v50 = vadd.f32 %v234_v49, %v233_v48 }
 0x1cd   :  { %v236_v51 = vrot.slane %v235_v50, 2 }
 0x1cf   :  { %v237_v52 = vadd.f32 %v236_v51, %v235_v50 }
 0x1d1   :  { %v238_v53 = vrot.slane %v237_v52, 1 }
 0x1d3   :  { %v239_v55 = vadd.f32 %v238_v53, %v237_v52 }
 0x1d5   :  { %v241_v56 = vsel %vm240_vm1, %v239_v55, 0.0  ;;  %v256_v58 = vsel %vm255_vm2, %v239_v55, 1e+30 }
 0x1d6   :  { %242 = vadd.xlane.f32.xlu0 %v241_v56 }
 0x1de   :  { %257 = vmin.xlane.f32.xlu0 %v256_v58 }
 0x249   :  { %v243_v59 = vpop.xlane.xlu0 %242 }
 0x24a   :  { %v244_v60 = vrot.slane %v243_v59, 4 }
 0x24c   :  { %v245_v61 = vadd.f32 %v244_v60, %v243_v59 }
 0x24e   :  { %v246_v62 = vrot.slane %v245_v61, 2 }
 0x250   :  { %v247_v63 = vadd.f32 %v246_v62, %v245_v61 }
 0x251   :  { %v258_v2 = vpop.xlane.xlu0 %257 }
 0x252   :  { %v248_v0 = vrot.slane %v247_v63, 1 }
 0x254   :  { %v249_v1 = vadd.f32 %v248_v0, %v247_v63 }
 0x256   :  { %291 = vpush %v249_v1 }
 0x257   :  { %293 = vpush %v258_v2 }
 0x287   :  { %s292_s2 = spop %291 }
 0x288   :  { %s251_s19 = smul.f32 0.125, %s292_s2  ;;  %s294_s20 = spop %293 }
 0x289   :  { %s260_s21 = ssub.f32 1.0, %s294_s20 }
 0x28a   :  { %s252_s22 = ssub.f32 1.0, %s251_s19 }
 0x28b   :  { %264 = sst [smem:[#allocation11 + $0x1]] %s260_s21 }
 0x28c   :  { %262 = sst [smem:[#allocation11]] %s252_s22 }
 0x28d   :  { %273 = dma.smem_to_hbm %s450_s23, 16, %s271_s18, [#allocation4]  }
 0x28e   :  { %441 = dma.done.wait [#allocation4], 16  }
 0x28f   :  { %442 = vsyncadd [#allocation4], 4294967280 }
 0x290   :  { %278 = sfence }
 0x291   :  { %279 = vsyncpa [#allocation3], 1 }
 0x292   :  { %280 = vsyncpa [#allocation6], 1 }
 0x293   :  { %281 = vsyncpa [#allocation9], 1 }
 0x294   :  { %282 = vsyncpa [#allocation4], 1 }

</bundles_post_ra>
